<compile_context>
chip_gen: v6e
topology: v6e:2x2x1
jax: 0.10.0
libtpu: 0.0.40
codegen_flags: <defaults>
</compile_context>

<pallas_src>
import functools
import math

import jax
import jax.numpy as jnp
from jax import lax
from jax.experimental import pallas as pl
from jax.experimental.pallas import tpu as pltpu


def _round_up(x: int, m: int) -> int:
    return ((x + m - 1) // m) * m


_FALLBACK_VMEM_CAP = 48 * 1024 * 1024   # safe under v7x's 64 MiB physical VMEM


def _vmem_cap_bytes() -> int:
    """Generation-aware VMEM budget cap (~100 MiB on v5e/v6e, ~48 MiB on v7x)."""
    try:
        phys = int(pltpu.get_tpu_info().vmem_capacity_bytes)
    except Exception:
        phys = 0
    if phys >= 48 * 1024 * 1024:
        return int(min(phys - 16 * 1024 * 1024, 100 * 1024 * 1024))
    return _FALLBACK_VMEM_CAP


# ---------------------------------------------------------------------------
# Path A: small vocabulary -> table resident in VMEM, gather via one-hot MXU
# matmul over a large token block.
# ---------------------------------------------------------------------------
def _onehot_vmem_need(vocab, emb, itemsize, T):
    return (2 * vocab * emb * itemsize        # table (2 pipeline buffers)
            + 2 * T * emb * max(4, itemsize)  # output blocks / f32 accumulator
            + 2 * T * 128 * 4                 # (T,1) id blocks pad to (T,128) i32
            + T * vocab * (itemsize + 4))     # one-hot + f32 matmul result


def _onehot_embed_kernel(ids_ref, emb_ref, out_ref, *, scale):
    """ids_ref: (T,1) i32 VMEM; emb_ref: (vocab, emb) VMEM; out_ref: (T, emb)."""
    T = out_ref.shape[0]
    vocab = emb_ref.shape[0]
    ids = ids_ref[...]                                        # (T, 1) int32
    iota = lax.broadcasted_iota(jnp.int32, (T, vocab), 1)     # lane-dim iota
    # bf16 table -> bf16 one-hot (exact row selection), f32 MXU accumulation.
    one_hot = (iota == ids).astype(emb_ref.dtype)             # (T, vocab)
    acc = jnp.dot(one_hot, emb_ref[...],
                  preferred_element_type=jnp.float32)         # MXU gather
    out_ref[...] = (acc * scale).astype(out_ref.dtype)        # whole-tile scale


def _token_embedding_onehot(flat_ids, emb_table, scale, tokens_per_block, cap):
    n = flat_ids.shape[0]
    vocab, emb = emb_table.shape
    itemsize = emb_table.dtype.itemsize
    T = tokens_per_block
    padded_n = _round_up(n, T)
    if padded_n != n:
        flat_ids = jnp.pad(flat_ids, (0, padded_n - n))        # pad id 0 (valid)
    ids2d = flat_ids.reshape(padded_n, 1)
    num_blocks = padded_n // T
    table_bytes = vocab * emb * itemsize

    vmem_need = _onehot_vmem_need(vocab, emb, itemsize, T)
    vmem_limit = int(min(cap, max(int(vmem_need * 1.25), 16 * 1024 * 1024)))

    cost = pl.CostEstimate(
        flops=2 * padded_n * vocab * emb + padded_n * emb,
        transcendentals=0,
        bytes_accessed=table_bytes + padded_n * 4 + padded_n * emb * itemsize,
    )

    out = pl.pallas_call(
        functools.partial(_onehot_embed_kernel, scale=scale),
        out_shape=jax.ShapeDtypeStruct((padded_n, emb), emb_table.dtype),
        grid=(num_blocks,),
        in_specs=[
            pl.BlockSpec((T, 1), lambda b: (b, 0)),
            # Full table resident in VMEM; constant index_map -> fetched once.
            # TODO(synk): pipeline_mode=pl.Buffered(1) would drop the second
            # (never re-fetched) table buffer; left at default 2-deep buffering
            # until 1-deep pipelining is confirmed on all target generations.
            pl.BlockSpec((vocab, emb), lambda b: (0, 0)),
        ],
        out_specs=pl.BlockSpec((T, emb), lambda b: (b, 0)),
        compiler_params=pltpu.CompilerParams(
            dimension_semantics=("parallel",),   # disjoint output blocks
            vmem_limit_bytes=vmem_limit,
        ),
        cost_estimate=cost,
    )(ids2d, emb_table)
    return out[:n]


# ---------------------------------------------------------------------------
# Path B: large vocabulary -> table stays in HBM; each grid step gathers a
# dense (T, emb) tile with T data-dependent row DMAs kept in flight together.
# ---------------------------------------------------------------------------
def _gather_embed_kernel(ids_ref, table_ref, out_ref, gbuf_ref, sem, *, scale):
    """ids_ref: (padded_n,) i32 SMEM (scalar prefetch); table_ref: (vocab, emb)
    HBM; out_ref / gbuf_ref: (T, emb) VMEM; sem: single shared DMA semaphore."""
    T = out_ref.shape[0]
    base = pl.program_id(0) * T

    # Issue all T row DMAs so HBM latency of the tiny transfers is overlapped.
    @pl.loop(0, T)
    def _(t):
        row = ids_ref[base + t]
        pltpu.make_async_copy(
            table_ref.at[pl.ds(row, 1)], gbuf_ref.at[pl.ds(t, 1)], sem
        ).start()

    # Drain: all copies are the same size, so each wait consumes exactly one
    # row-sized completion on the shared semaphore.
    @pl.loop(0, T)
    def _(t):
        pltpu.make_async_copy(
            table_ref.at[pl.ds(0, 1)], gbuf_ref.at[pl.ds(t, 1)], sem
        ).wait()

    out_ref[...] = (gbuf_ref[...].astype(jnp.float32) * scale).astype(out_ref.dtype)


def _token_embedding_gather(flat_ids, emb_table, scale, tokens_per_block, cap):
    n = flat_ids.shape[0]
    vocab, emb = emb_table.shape
    itemsize = emb_table.dtype.itemsize
    row_bytes = emb * itemsize

    # Largest token block whose buffers comfortably fit the VMEM budget.
    t_by_vmem = max(8, ((cap // 4) // max(row_bytes, 1)) // 8 * 8)
    T = max(8, min(tokens_per_block, _round_up(n, 8), t_by_vmem))
    padded_n = _round_up(n, T)
    if padded_n != n:
        flat_ids = jnp.pad(flat_ids, (0, padded_n - n))
    num_blocks = padded_n // T

    vmem_need = 3 * T * emb * itemsize + T * emb * 4
    vmem_limit = int(min(cap, max(int(vmem_need * 1.5), 16 * 1024 * 1024)))

    cost = pl.CostEstimate(
        flops=padded_n * emb,
        transcendentals=0,
        bytes_accessed=2 * padded_n * emb * itemsize + padded_n * 4,
    )

    # TODO(synk): mid-size tables that fit VMEM could use a VMEM-resident table
    # with an on-chip gather (reads the table from HBM exactly once); skipped to
    # keep lowering risk low.
    # TODO(synk): ids are scalar-prefetched whole into SMEM; chunk the call for
    # token streams beyond ~64K tokens to stay within SMEM.
    out = pl.pallas_call(
        functools.partial(_gather_embed_kernel, scale=scale),
        out_shape=jax.ShapeDtypeStruct((padded_n, emb), emb_table.dtype),
        grid_spec=pltpu.PrefetchScalarGridSpec(
            num_scalar_prefetch=1,
            grid=(num_blocks,),
            in_specs=[pl.BlockSpec(memory_space=pl.ANY)],    # table stays in HBM
            out_specs=pl.BlockSpec((T, emb), lambda b, ids: (b, 0)),
            scratch_shapes=[
                pltpu.VMEM((T, emb), emb_table.dtype),
                pltpu.SemaphoreType.DMA,
            ],
        ),
        compiler_params=pltpu.CompilerParams(
            dimension_semantics=("parallel",),   # each step is self-contained
            vmem_limit_bytes=vmem_limit,
        ),
        cost_estimate=cost,
    )(flat_ids, emb_table)
    return out[:n]


# ---------------------------------------------------------------------------
# Public wrapper: TokenEmbedding.forward
# ---------------------------------------------------------------------------
def token_embedding(tokens, emb_table, *, tokens_per_block=512,
                    gather_tokens_per_block=128):
    """tokens: int array (any shape); emb_table: (vocab, emb).
    Returns tokens.shape + (emb,) array = Embedding(tokens) * sqrt(emb)."""
    vocab, emb = emb_table.shape
    scale = math.sqrt(emb)
    itemsize = emb_table.dtype.itemsize

    # Clamp so an out-of-range token can never cause an OOB HBM/VMEM read.
    flat = jnp.clip(tokens.reshape(-1).astype(jnp.int32), 0, vocab - 1)
    n = flat.shape[0]

    cap = _vmem_cap_bytes()

    # One-hot MXU path only while it stays memory-bound on every generation:
    # per-token matmul cost 2*vocab*emb flops vs per-token emb*itemsize write.
    # f32 tables get a tighter vocab cap (v5e MXU is much slower in f32).
    vocab_cap = 1024 if itemsize <= 2 else 512
    T_a = min(tokens_per_block, _round_up(n, 8))
    use_onehot = (vocab <= vocab_cap and
                  _onehot_vmem_need(vocab, emb, itemsize, T_a) * 1.25 <= cap)

    if use_onehot:
        out_flat = _token_embedding_onehot(flat, emb_table, scale, T_a, cap)
    else:
        out_flat = _token_embedding_gather(flat, emb_table, scale,
                                           gather_tokens_per_block, cap)
    return out_flat.reshape(*tokens.shape, emb)


if __name__ == "__main__":
    key = jax.random.PRNGKey(0)
    k_emb1, k_tok1, k_emb2, k_tok2 = jax.random.split(key, 4)

    seq_len, batch = 8, 2

    # --- Path A: small vocab -> one-hot MXU gather (VMEM-resident table) ---
    vocab_a, emb_a = 64, 128
    table_a = jax.random.normal(k_emb1, (vocab_a, emb_a), dtype=jnp.float32)
    tokens_a = jax.random.randint(k_tok1, (seq_len, batch), 0, vocab_a,
                                  dtype=jnp.int32)
    out_a = jax.block_until_ready(token_embedding(tokens_a, table_a))
    ref_a = jnp.take(table_a, tokens_a, axis=0) * math.sqrt(emb_a)
    assert out_a.shape == (seq_len, batch, emb_a)
    assert jnp.allclose(out_a, ref_a, atol=1e-5, rtol=1e-5)

    # --- Path B: large vocab -> manual per-row DMA gather from HBM ---
    vocab_b, emb_b = 2048, 128
    table_b = jax.random.normal(k_emb2, (vocab_b, emb_b), dtype=jnp.float32)
    tokens_b = jax.random.randint(k_tok2, (seq_len, batch), 0, vocab_b,
                                  dtype=jnp.int32)
    out_b = jax.block_until_ready(token_embedding(tokens_b, table_b))
    ref_b = jnp.take(table_b, tokens_b, axis=0) * math.sqrt(emb_b)
    assert out_b.shape == (seq_len, batch, emb_b)
    assert jnp.allclose(out_b, ref_b, atol=1e-5, rtol=1e-5)

    print("KERNEL_OK")
</pallas_src>

<mosaic_0001>
module attributes {stable_mosaic.version = 11 : i64} {
  func.func @_onehot_embed_kernel(%arg0: i32, %arg1: memref<16x1xi32, #tpu.memory_space<vmem>>, %arg2: memref<64x128xf32, #tpu.memory_space<vmem>>, %arg3: memref<16x128xf32, #tpu.memory_space<vmem>>) attributes {dimension_semantics = [#tpu.dimension_semantics<parallel>], iteration_bounds = array<i64: 1>, scalar_prefetch = 0 : i64, scratch_operands = 0 : i64, tpu.core_type = #tpu.core_type<tc>, window_params = [{transform_indices = @transform_0, window_bounds = array<i64: 16, 1>}, {pipeline_mode = #tpu.pipeline_mode<synchronous>, transform_indices = @transform_1, window_bounds = array<i64: 64, 128>}, {transform_indices = @transform_2, window_bounds = array<i64: 16, 128>}]} {
    %c0 = arith.constant 0 : index
    %c0_0 = arith.constant 0 : index
    %0 = vector.load %arg1[%c0, %c0_0] : memref<16x1xi32, #tpu.memory_space<vmem>>, vector<16x1xi32>
    %1 = tpu.iota {dimensions = array<i32: 1>} : vector<16x64xi32>
    %2 = vector.broadcast %0 : vector<16x1xi32> to vector<16x64xi32>
    %3 = arith.cmpi eq, %1, %2 : vector<16x64xi32>
    %4 = arith.extui %3 : vector<16x64xi1> to vector<16x64xi32>
    %5 = arith.sitofp %4 : vector<16x64xi32> to vector<16x64xf32>
    %c0_1 = arith.constant 0 : index
    %c0_2 = arith.constant 0 : index
    %6 = vector.load %arg2[%c0_1, %c0_2] : memref<64x128xf32, #tpu.memory_space<vmem>>, vector<64x128xf32>
    %cst = arith.constant dense<0.000000e+00> : vector<16x128xf32>
    %7 = tpu.matmul %5, %6, %cst {dimension_numbers = #tpu.dot_dimension_numbers<[1], [0], [0], [1], [0, 0, 1, 1], [], []>} : vector<16x64xf32>, vector<64x128xf32>, vector<16x128xf32> -> vector<16x128xf32>
    %cst_3 = arith.constant 11.3137083 : f32
    %8 = vector.broadcast %cst_3 : f32 to vector<16x128xf32>
    %9 = arith.mulf %7, %8 : vector<16x128xf32>
    %c0_4 = arith.constant 0 : index
    %c0_5 = arith.constant 0 : index
    %10 = vector.load %arg3[%c0_4, %c0_5] : memref<16x128xf32, #tpu.memory_space<vmem>>, vector<16x128xf32>
    tpu.vector_store %arg3[%c0_4, %c0_5], %9 {strides = array<i32>} : memref<16x128xf32, #tpu.memory_space<vmem>>, vector<16x128xf32>,
    return
  }
  func.func @transform_0(%arg0: i32) -> (i32, i32) {
    %c0_i32 = arith.constant 0 : i32
    %c0_i32_0 = arith.constant 0 : i32
    return %arg0, %c0_i32 : i32, i32
  }
  func.func @transform_1(%arg0: i32) -> (i32, i32) {
    %c0_i32 = arith.constant 0 : i32
    %c0_i32_0 = arith.constant 0 : i32
    %c0_i32_1 = arith.constant 0 : i32
    return %c0_i32, %c0_i32_0 : i32, i32
  }
  func.func @transform_2(%arg0: i32) -> (i32, i32) {
    %c0_i32 = arith.constant 0 : i32
    %c0_i32_0 = arith.constant 0 : i32
    return %arg0, %c0_i32 : i32, i32
  }
}

</mosaic_0001>

<bundles_post_ra>
// kernel: tpu_custom_call.1
= control target key start
LH: loop header
LB: loop body
LE: loop exit
PB: predicated region body
PF: predicated region fallthrough
CT: control target
= control target key end

     0   :  { %7 = vsyncpa [#allocation3], 0  ;;  %s276_s0 = inlined_call_operand.vmem [shape: s32[16,1], index: 0, kind: input, shape index: {}]   ;;  %s277_s1 = inlined_call_operand.hbm [shape: f32[64,128], index: 1, kind: input, shape index: {}]   ;;  %s278_s2 = inlined_call_operand.hbm [shape: f32[16,128], index: 2, kind: output, shape index: {}]  }
   0x1   :  { %8 = vsyncpa [#allocation4], 0  ;;  %s237_s9 = smov [#allocation2]  }
   0x2   :  { %s16_s10 = sshll.u32 %s237_s9, 4  ;;  %s17_s10 = int_to_ptr.vmem [resolvable:$true] %s16_s10 }
   0x3   :  { %s201_s11 = scalar_lea.vmem %s17_s10, 1024  ;;  %p206_p1 = scmp.lt.s32.totalorder %s17_s10, %s17_s10 }
   0x4   :  { %p202_p0 = scmp.ne.s32.totalorder %s17_s10, %s201_s11  ;;  %p207_p2 = scmp.lt.s32.totalorder %s201_s11, %s201_s11 }
   0x6   :  { %p208_p3 = por %p207_p2, %p206_p1 }
   0x8   :  { %p209_p4 = pnand %p208_p3, %p202_p0 }
   0xa   :  { %212 = shalt.err (!%p209_p4)
}
   0xb   :  { %s238_s12 = smov 128   ;;  %s239_s13 = smov 8  }
   0xc   :  { %22 = dma.hbm_to_vmem [thread:$0]  %s277_s1, 1024, %s17_s10, [#allocation3], %s238_s12, %s238_s12, %s239_s13  }
   0xd   :  { %233 = dma.done.wait [#allocation3], 1024  }
   0xe   :  { %234 = vsyncadd [#allocation3], 4294966272  ;;  %v240_v0 = vmov 0   ;;  %v26_v1 = vld [vmem:[%s276_s0] sm:$0xff]  ;;  %v49_v2 = vld [vmem:[#allocation2 + $0x38] sm:$0xff]  ;;  %v28_v11 = vlaneseq  ;;  %vm50_vm0 = vcmask 523264  }
   0xf   :  { %192 = vset.pattern.permute.xlu0 %v240_v0  ;;  %167 = vmatprep.subr.mxu0 %v49_v2  ;;  %v48_v3 = vld [vmem:[#allocation2 + $0x30] sm:$0xff]  ;;  %v27_v4 = vld [vmem:[%s276_s0 + $0x8] sm:$0xff]  ;;  %v46_v6 = vld [vmem:[#allocation2 + $0x20] sm:$0xff]  ;;  %v241_v14 = vmov 0.0   ;;  %s242_s0 = smov [#allocation5]  }
  0x10   :  { %31 = vperm.xlu0 %192, %v26_v1   ;;  %168 = vmatpush3.msra.mxu0 %v49_v2  ;;  %v47_v5 = vld [vmem:[#allocation2 + $0x28] sm:$0xff]  ;;  %v45_v7 = vld [vmem:[#allocation2 + $0x18] sm:$0xff]  ;;  %v44_v8 = vld [vmem:[#allocation2 + $0x10] sm:$0xff]  ;;  %v29_v12 = vand.u32 127, %v28_v11  ;;  %s141_s1 = sshll.u32 %s242_s0, 4  ;;  %s142_s1 = int_to_ptr.vmem [resolvable:$true] %s141_s1 }
  0x11   :  { %169 = vmatprep.subr.mxu0 %v48_v3  ;;  %v43_v9 = vld [vmem:[#allocation2 + $0x8] sm:$0xff]  ;;  %v42_v10 = vld [vmem:[#allocation2] sm:$0xff]  ;;  %s213_s20 = scalar_lea.vmem %s142_s1, 256  ;;  %p218_p6 = scmp.lt.s32.totalorder %s142_s1, %s142_s1 }
  0x12   :  { %170 = vmatpush3.msra.mxu0 %v48_v3  ;;  %p214_p5 = scmp.ne.s32.totalorder %s142_s1, %s213_s20  ;;  %p219_p7 = scmp.lt.s32.totalorder %s213_s20, %s213_s20 }
  0x13   :  { %171 = vmatprep.subr.mxu0 %v47_v5 }
  0x14   :  { %34 = vperm.xlu0 %192, %v27_v4   ;;  %172 = vmatpush3.msra.mxu0 %v47_v5  ;;  %p220_p8 = por %p219_p7, %p218_p6 }
  0x15   :  { %173 = vmatprep.subr.mxu0 %v46_v6 }
  0x16   :  { %174 = vmatpush3.msra.mxu0 %v46_v6  ;;  %p221_p9 = pnand %p220_p8, %p214_p5 }
  0x17   :  { %175 = vmatprep.subr.mxu0 %v45_v7 }
  0x18   :  { %176 = vmatpush3.msra.mxu0 %v45_v7 }
  0x19   :  { %177 = vmatprep.subr.mxu0 %v44_v8 }
  0x1a   :  { %178 = vmatpush3.msra.mxu0 %v44_v8 }
  0x1b   :  { %179 = vmatprep.subr.mxu0 %v43_v9 }
  0x1c   :  { %180 = vmatpush3.msra.mxu0 %v43_v9 }
  0x1d   :  { %181 = vmatprep.subr.mxu0 %v42_v10 }
  0x1e   :  { %182 = vmatpush3.msra.mxu0 %v42_v10 }
  0x8b   :  { %v32_v13 = vpop.permute.xlu0 %31 }
  0x8c   :  { %vm36_vm1 = vcmp.eq.s32.totalorder %v29_v12, %v32_v13 }
  0x8d   :  { %v153_v15 = vsel %vm36_vm1, 1.0, %v241_v14 }
  0x8e   :  { %183 = vmatprep.mubr.msk.f32.mxu0 %vm50_vm0, %v153_v15 }
  0x8f   :  { %v35_v16 = vpop.permute.xlu0 %34 }
  0x90   :  { %vm37_vm2 = vcmp.eq.s32.totalorder %v29_v12, %v35_v16 }
  0x91   :  { %v154_v17 = vsel %vm37_vm2, 1.0, %v241_v14 }
  0x92   :  { %184 = vmatmul.mubr.msk.f32.vlgmr.msra.gmra.mxu0 %vm50_vm0, %v154_v17 }
 0x152   :  { %v185_v18 = vpop.f32.mrf.mxu0 }
 0x153   :  { %v133_v19 = vmul.f32 11.313708, %v185_v18 }
 0x154   :  { %v123_v20 = vpop.f32.mrf.mxu0 }
 0x155   :  { %135 = vst [vmem:[#allocation5 + $0x8] sm:$0xff] %v133_v19  ;;  %v132_v21 = vmul.f32 11.313708, %v123_v20 }
 0x157   :  { %134 = vst [vmem:[#allocation5] sm:$0xff] %v132_v21 }
 0x158   :  { %224 = shalt.err (!%p221_p9)
}
 0x159   :  { %147 = dma.vmem_to_hbm [thread:$0]  %s142_s1, 256, %s278_s2, [#allocation4], %s238_s12, %s238_s12, %s239_s13  }
 0x15a   :  { %235 = dma.done.wait [#allocation4], 256  }
 0x15b   :  { %236 = vsyncadd [#allocation4], 4294967040 }
 0x15c   :  { %151 = vsyncpa [#allocation3], 1 }
 0x15d   :  { %152 = vsyncpa [#allocation4], 1 }

</bundles_post_ra>
